<compile_context>
chip_gen: v6e
topology: v6e:2x2x1
jax: 0.10.0
libtpu: 0.0.40
codegen_flags: <defaults>
</compile_context>

<pallas_src>
import functools

import jax
import jax.numpy as jnp
import numpy as np
from jax import lax
from jax.experimental import pallas as pl
from jax.experimental.pallas import tpu as pltpu


# ----------------------------------------------------------------------------- helpers
def _round_up(v, m):
    return ((v + m - 1) // m) * m


def _vmem_capacity_bytes():
    """Hardware VMEM capacity; conservative (v7x-sized) fallback if the query fails."""
    try:
        info = pltpu.get_tpu_info()
        cap = getattr(info, "vmem_capacity_bytes", None)
        if cap:
            return int(cap)
    except Exception:
        pass
    return 64 * 1024 * 1024


def _hamilton_weight(r, i, j, k):
    """Build the (4*IF, 4*OF) quaternion weight.

    Row blocks = input components (r, i, j, k), column blocks = output components:
        [[ r,  i,  j,  k],
         [-i,  r,  k, -j],
         [-j, -k,  r,  i],
         [-k,  j, -i,  r]]
    """
    row_r = jnp.concatenate([r, i, j, k], axis=1)
    row_i = jnp.concatenate([-i, r, k, -j], axis=1)
    row_j = jnp.concatenate([-j, -k, r, i], axis=1)
    row_k = jnp.concatenate([-k, j, -i, r], axis=1)
    return jnp.concatenate([row_r, row_i, row_j, row_k], axis=0)


# ----------------------------------------------------------------------------- kernel
def _quaternion_linear_kernel(x_ref, w_ref, b_ref, o_ref, *, compute_dtype, precision):
    """One batch tile: out = cast(x_tile) @ W + bias (single fused MXU matmul)."""
    x = x_ref[...]
    if compute_dtype is not None and x.dtype != compute_dtype:
        x = x.astype(compute_dtype)   # VPU cast inside the kernel; hides under the matmul.
    acc = jnp.dot(x, w_ref[...], preferred_element_type=jnp.float32, precision=precision)
    o_ref[...] = (acc + b_ref[...]).astype(o_ref.dtype)


# ----------------------------------------------------------------------------- wrapper
def quaternion_linear(x, r_w, i_w, j_w, k_w, bias=None, *,
                      compute_dtype=jnp.bfloat16, out_dtype=None, block_rows=None):
    """Pallas-backed equivalent of QuaternionLinear.forward (2-D or 3-D input).

    compute_dtype=jnp.bfloat16 (default): bf16 matmul with f32 accumulation -- the fast path.
    compute_dtype=jnp.float32: true f32 matmul (precision=HIGHEST); 3-6x slower on the MXU,
    use only when bit-faithful parity with the PyTorch f32 module is required.
    out_dtype defaults to the compute dtype (or x.dtype if compute_dtype is None).
    """
    orig_shape = x.shape
    if x.ndim == 3:
        T, N, C = x.shape
        x2 = x.reshape(T * N, C)
    elif x.ndim == 2:
        x2 = x
    else:
        raise NotImplementedError("QuaternionLinear only supports 2-D or 3-D inputs")

    B, C = x2.shape
    IF, OF = r_w.shape
    assert C == 4 * IF, f"expected input feature dim {4 * IF}, got {C}"
    in_dim, out_dim = 4 * IF, 4 * OF

    cdt = jnp.dtype(compute_dtype) if compute_dtype is not None else None
    if out_dtype is None:
        out_dtype = cdt if cdt is not None else x2.dtype
    out_dtype = jnp.dtype(out_dtype)
    w_dtype = cdt if cdt is not None else jnp.dtype(x2.dtype)
    precision = lax.Precision.HIGHEST if (cdt == jnp.dtype(jnp.float32)) else None

    # Fused Hamilton weight (one-time O(16*IF*OF) cost, then VMEM-resident across the grid).
    W = _hamilton_weight(r_w, i_w, j_w, k_w).astype(w_dtype)
    if bias is None:
        bias = jnp.zeros((out_dim,), dtype=jnp.float32)
    b2 = bias.astype(jnp.float32).reshape(1, out_dim)

    # Lane-dense output: pad 4*OF up to a multiple of 128 (unmasked vst), slice afterwards.
    out_dim_p = _round_up(out_dim, 128)
    if out_dim_p != out_dim:
        W = jnp.pad(W, ((0, 0), (0, out_dim_p - out_dim)))
        b2 = jnp.pad(b2, ((0, 0), (0, out_dim_p - out_dim)))

    # ----- batch tile selection against a hardware-derived VMEM budget ---------------
    x_bytes = jnp.dtype(x2.dtype).itemsize          # x is read in its ORIGINAL dtype
    w_bytes = jnp.dtype(w_dtype).itemsize
    o_bytes = out_dtype.itemsize

    vmem_cap = _vmem_capacity_bytes()
    vmem_budget = max(16 << 20, vmem_cap // 2)      # ~32 MiB on v7x, ~64 MiB on v5e/v6e

    # Pallas double-buffers every input, even constant-index W/bias -> factor 2.
    resident = 2 * (in_dim * out_dim_p * w_bytes + out_dim_p * 4)
    per_row = 2 * (in_dim * x_bytes + out_dim_p * o_bytes)       # double-buffered x / out

    if resident + 8 * per_row > vmem_budget:
        # TODO(synk): trigger an N/K-tiled variant (f32 accumulator scratch) here instead.
        raise NotImplementedError(
            f"Quaternion weight ({resident / 2**20:.1f} MiB double-buffered) does not fit "
            f"the {vmem_budget / 2**20:.0f} MiB VMEM budget; N/K tiling not yet implemented.")

    tb_cap = (vmem_budget - resident) // per_row
    if block_rows is not None:
        tb_cap = min(tb_cap, int(block_rows))
    tb_cap = max(8, (int(tb_cap) // 8) * 8)          # (8, 128) sublane rule

    if B < 16 and B <= tb_cap:
        TB = B                                       # full-dim block (allowed even if B % 8)
    else:
        # >= 2 grid steps whenever B allows it, so megacore "parallel" can shard on v7x.
        half = _round_up(-(-B // 2), 8)
        TB = max(8, min(tb_cap, half))
    grid = (pl.cdiv(B, TB),)

    vmem_need = resident + TB * per_row
    vmem_limit = int(min(vmem_cap - (8 << 20),
                         max(32 << 20, vmem_need + (4 << 20))))

    cost = pl.CostEstimate(
        flops=2 * B * in_dim * out_dim_p,
        transcendentals=0,
        bytes_accessed=int(B * in_dim * x_bytes + in_dim * out_dim_p * w_bytes
                           + out_dim_p * 4 + B * out_dim_p * o_bytes),
    )

    kernel = functools.partial(_quaternion_linear_kernel,
                               compute_dtype=cdt, precision=precision)

    out = pl.pallas_call(
        kernel,
        out_shape=jax.ShapeDtypeStruct((B, out_dim_p), out_dtype),
        grid=grid,
        in_specs=[
            pl.BlockSpec((TB, in_dim), lambda b: (b, 0)),            # x: batch-tiled
            pl.BlockSpec((in_dim, out_dim_p), lambda b: (0, 0)),     # W: resident
            pl.BlockSpec((1, out_dim_p), lambda b: (0, 0)),          # bias: resident
        ],
        out_specs=pl.BlockSpec((TB, out_dim_p), lambda b: (b, 0)),
        compiler_params=pltpu.CompilerParams(
            dimension_semantics=("parallel",),
            vmem_limit_bytes=vmem_limit,
        ),
        cost_estimate=cost,
    )(x2, W, b2)

    if out_dim_p != out_dim:
        out = out[:, :out_dim]
    if len(orig_shape) == 3:
        out = out.reshape(orig_shape[0], orig_shape[1], out_dim)
    return out


# ----------------------------------------------------------------------------- params / reference
def init_quaternion_linear_params(key, in_features, out_features, dtype=jnp.float32):
    """Deterministic synthetic init (glorot-like scale; bias filled with 0 as in
    QuaternionLinear.reset_parameters)."""
    IF, OF = in_features // 4, out_features // 4
    kr, ki, kj, kk = jax.random.split(key, 4)
    scale = 1.0 / np.sqrt(2.0 * (IF + OF))
    r_w = (jax.random.normal(kr, (IF, OF)) * scale).astype(dtype)
    i_w = (jax.random.normal(ki, (IF, OF)) * scale).astype(dtype)
    j_w = (jax.random.normal(kj, (IF, OF)) * scale).astype(dtype)
    k_w = (jax.random.normal(kk, (IF, OF)) * scale).astype(dtype)
    bias = jnp.zeros((4 * OF,), dtype=dtype)
    return r_w, i_w, j_w, k_w, bias


def _reference(x, r, i, j, k, bias):
    """Pure-JAX reference: explicit concatenated quaternion weight matrix (f32)."""
    col_r = jnp.concatenate([r, -i, -j, -k], axis=0)
    col_i = jnp.concatenate([i, r, -k, j], axis=0)
    col_j = jnp.concatenate([j, k, r, -i], axis=0)
    col_k = jnp.concatenate([k, -j, i, r], axis=0)
    W = jnp.concatenate([col_r, col_i, col_j, col_k], axis=1)
    x2 = x.reshape(-1, x.shape[-1]).astype(jnp.float32)
    out = x2 @ W.astype(jnp.float32) + bias.astype(jnp.float32)
    return out.reshape(x.shape[:-1] + (W.shape[1],))


# ----------------------------------------------------------------------------- test
if __name__ == "__main__":
    key = jax.random.PRNGKey(0)
    kx2, kw, kx3 = jax.random.split(key, 3)

    # QuaternionLinear(in_features=128, out_features=128) -> per-component 32 -> 32
    in_features, out_features = 128, 128
    r_w, i_w, j_w, k_w, bias = init_quaternion_linear_params(kw, in_features, out_features)

    # --- 2-D input, f32 compute path (precision=HIGHEST; faithful to the PyTorch f32 module) ---
    x2d = jax.random.normal(kx2, (8, in_features), dtype=jnp.float32)
    out_f32 = jax.block_until_ready(
        quaternion_linear(x2d, r_w, i_w, j_w, k_w, bias, compute_dtype=jnp.float32))
    ref2d = _reference(x2d, r_w, i_w, j_w, k_w, bias)
    assert out_f32.shape == (8, out_features), out_f32.shape
    assert out_f32.dtype == jnp.float32
    np.testing.assert_allclose(np.asarray(out_f32), np.asarray(ref2d), rtol=2e-5, atol=2e-5)

    # --- 2-D input, default bf16 compute path (in-kernel cast, f32 accum, bf16 output) ---
    out_bf16 = jax.block_until_ready(
        quaternion_linear(x2d, r_w, i_w, j_w, k_w, bias))
    assert out_bf16.dtype == jnp.bfloat16
    np.testing.assert_allclose(np.asarray(out_bf16, dtype=np.float32), np.asarray(ref2d),
                               rtol=5e-2, atol=5e-2)

    # --- 3-D input; small block_rows forces a multi-step grid with a partial tail tile ---
    x3d = jax.random.normal(kx3, (5, 8, in_features), dtype=jnp.float32)   # flattens to B=40
    out3 = jax.block_until_ready(
        quaternion_linear(x3d, r_w, i_w, j_w, k_w, bias, block_rows=16))
    ref3 = _reference(x3d, r_w, i_w, j_w, k_w, bias)
    assert out3.shape == (5, 8, out_features), out3.shape
    np.testing.assert_allclose(np.asarray(out3, dtype=np.float32), np.asarray(ref3),
                               rtol=5e-2, atol=5e-2)

    # --- f32 output on the bf16 compute path via the explicit out_dtype argument ---
    out_mix = jax.block_until_ready(
        quaternion_linear(x2d, r_w, i_w, j_w, k_w, bias, out_dtype=jnp.float32))
    assert out_mix.dtype == jnp.float32
    np.testing.assert_allclose(np.asarray(out_mix), np.asarray(ref2d), rtol=5e-2, atol=5e-2)

    print("KERNEL_OK")
</pallas_src>

<mosaic_0001>
module attributes {stable_mosaic.version = 11 : i64} {
  func.func @_quaternion_linear_kernel(%arg0: i32, %arg1: memref<8x128xf32, #tpu.memory_space<vmem>>, %arg2: memref<128x128xf32, #tpu.memory_space<vmem>>, %arg3: memref<1x128xf32, #tpu.memory_space<vmem>>, %arg4: memref<8x128xf32, #tpu.memory_space<vmem>>) attributes {dimension_semantics = [#tpu.dimension_semantics<parallel>], iteration_bounds = array<i64: 1>, scalar_prefetch = 0 : i64, scratch_operands = 0 : i64, tpu.core_type = #tpu.core_type<tc>, window_params = [{transform_indices = @transform_0, window_bounds = array<i64: 8, 128>}, {pipeline_mode = #tpu.pipeline_mode<synchronous>, transform_indices = @transform_1, window_bounds = array<i64: 128, 128>}, {pipeline_mode = #tpu.pipeline_mode<synchronous>, transform_indices = @transform_2, window_bounds = array<i64: 1, 128>}, {transform_indices = @transform_3, window_bounds = array<i64: 8, 128>}]} {
    %c0 = arith.constant 0 : index
    %c0_0 = arith.constant 0 : index
    %0 = vector.load %arg1[%c0, %c0_0] : memref<8x128xf32, #tpu.memory_space<vmem>>, vector<8x128xf32>
    %c0_1 = arith.constant 0 : index
    %c0_2 = arith.constant 0 : index
    %1 = vector.load %arg2[%c0_1, %c0_2] : memref<128x128xf32, #tpu.memory_space<vmem>>, vector<128x128xf32>
    %cst = arith.constant dense<0.000000e+00> : vector<8x128xf32>
    %2 = tpu.matmul %0, %1, %cst {dimension_numbers = #tpu.dot_dimension_numbers<[1], [0], [0], [1], [0, 0, 1, 1], [], []>, precision = #tpu.contract_precision<fp32>} : vector<8x128xf32>, vector<128x128xf32>, vector<8x128xf32> -> vector<8x128xf32>
    %c0_3 = arith.constant 0 : index
    %c0_4 = arith.constant 0 : index
    %3 = vector.load %arg3[%c0_3, %c0_4] : memref<1x128xf32, #tpu.memory_space<vmem>>, vector<1x128xf32>
    %4 = vector.broadcast %3 : vector<1x128xf32> to vector<8x128xf32>
    %5 = arith.addf %2, %4 : vector<8x128xf32>
    %c0_5 = arith.constant 0 : index
    %c0_6 = arith.constant 0 : index
    %6 = vector.load %arg4[%c0_5, %c0_6] : memref<8x128xf32, #tpu.memory_space<vmem>>, vector<8x128xf32>
    tpu.vector_store %arg4[%c0_5, %c0_6], %5 {strides = array<i32>} : memref<8x128xf32, #tpu.memory_space<vmem>>, vector<8x128xf32>,
    return
  }
  func.func @transform_0(%arg0: i32) -> (i32, i32) {
    %c0_i32 = arith.constant 0 : i32
    %c0_i32_0 = arith.constant 0 : i32
    return %arg0, %c0_i32 : i32, i32
  }
  func.func @transform_1(%arg0: i32) -> (i32, i32) {
    %c0_i32 = arith.constant 0 : i32
    %c0_i32_0 = arith.constant 0 : i32
    %c0_i32_1 = arith.constant 0 : i32
    return %c0_i32, %c0_i32_0 : i32, i32
  }
  func.func @transform_2(%arg0: i32) -> (i32, i32) {
    %c0_i32 = arith.constant 0 : i32
    %c0_i32_0 = arith.constant 0 : i32
    %c0_i32_1 = arith.constant 0 : i32
    return %c0_i32, %c0_i32_0 : i32, i32
  }
  func.func @transform_3(%arg0: i32) -> (i32, i32) {
    %c0_i32 = arith.constant 0 : i32
    %c0_i32_0 = arith.constant 0 : i32
    return %arg0, %c0_i32 : i32, i32
  }
}

</mosaic_0001>

<bundles_post_ra>
// kernel: tpu_custom_call.1
= control target key start
LH: loop header
LB: loop body
LE: loop exit
PB: predicated region body
PF: predicated region fallthrough
CT: control target
= control target key end

     0   :  { %8 = vsyncpa [#allocation3], 0  ;;  %s1511_s0 = inlined_call_operand.hbm [shape: f32[8,128], index: 0, kind: input, shape index: {}]   ;;  %s1512_s1 = inlined_call_operand.hbm [shape: f32[128,128], index: 1, kind: input, shape index: {}]   ;;  %s1513_s2 = inlined_call_operand.vmem [shape: f32[1,128], index: 2, kind: input, shape index: {}]   ;;  %s1514_s3 = inlined_call_operand.hbm [shape: f32[8,128], index: 3, kind: output, shape index: {}]  }
   0x1   :  { %9 = vsyncpa [#allocation6], 0 }
   0x2   :  { %10 = vsyncpa [#allocation4], 0  ;;  %s1109_s12 = smov [#allocation2]   ;;  %s1110_s14 = smov [#allocation5]  }
   0x3   :  { %s17_s13 = sshll.u32 %s1109_s12, 4  ;;  %s26_s15 = sshll.u32 %s1110_s14, 4  ;;  %s18_s13 = int_to_ptr.vmem [resolvable:$true] %s17_s13  ;;  %s27_s15 = int_to_ptr.vmem [resolvable:$true] %s26_s15 }
   0x4   :  { %s1051_s16 = scalar_lea.vmem %s18_s13, 128  ;;  %p1056_p1 = scmp.lt.s32.totalorder %s18_s13, %s18_s13 }
   0x5   :  { %p1052_p0 = scmp.ne.s32.totalorder %s18_s13, %s1051_s16  ;;  %p1057_p2 = scmp.lt.s32.totalorder %s1051_s16, %s1051_s16 }
   0x7   :  { %p1058_p3 = por %p1057_p2, %p1056_p1 }
   0x9   :  { %p1059_p4 = pnand %p1058_p3, %p1052_p0 }
   0xb   :  { %1062 = shalt.err (!%p1059_p4)
}
   0xc   :  { %20 = dma.hbm_to_vmem [thread:$0]  %s1511_s0, 128, %s18_s13, [#allocation3]  }
   0xd   :  { %s1071_s19 = scalar_lea.vmem %s27_s15, 2048  ;;  %p1076_p6 = scmp.lt.s32.totalorder %s27_s15, %s27_s15 }
   0xe   :  { %p1072_p5 = scmp.ne.s32.totalorder %s27_s15, %s1071_s19  ;;  %p1077_p7 = scmp.lt.s32.totalorder %s1071_s19, %s1071_s19 }
  0x10   :  { %p1078_p8 = por %p1077_p7, %p1076_p6 }
  0x12   :  { %p1079_p9 = pnand %p1078_p8, %p1072_p5 }
  0x14   :  { %1082 = shalt.err (!%p1079_p9)
}
  0x15   :  { %s1111_s20 = smov 128   ;;  %s1112_s21 = smov 8  }
  0x16   :  { %32 = dma.hbm_to_vmem [thread:$0]  %s1512_s1, 2048, %s27_s15, [#allocation6], %s1111_s20, %s1111_s20, %s1112_s21  }
  0x17   :  { %1103 = dma.done.wait [#allocation3], 128  }
  0x18   :  { %1104 = vsyncadd [#allocation3], 4294967168 }
  0x19   :  { %1105 = dma.done.wait [#allocation6], 2048  }
  0x1a   :  { %1106 = vsyncadd [#allocation6], 4294965248  ;;  %v1113_v0 = vmov 0.0   ;;  %vm1114_vm0 = vmmov 0   ;;  %v57_v1 = vld [vmem:[#allocation5 + $0x78] sm:$0xff]  ;;  %v56_v2 = vld [vmem:[#allocation5 + $0x70] sm:$0xff] }
  0x1b   :  { %826 = vmatprep.subr.mxu0 %v1113_v0  ;;  %861 = vmatprep.subr.mxu1 %v1113_v0  ;;  %v55_v3 = vld [vmem:[#allocation5 + $0x68] sm:$0xff]  ;;  %v1148_v4 = vand.u32 4294901760, %v57_v1  ;;  %v1150_v5 = vand.u32 4294901760, %v56_v2  ;;  %v54_v7 = vld [vmem:[#allocation5 + $0x60] sm:$0xff]  ;;  %v53_v8 = vld [vmem:[#allocation5 + $0x58] sm:$0xff]  ;;  %s1115_s24 = smov [#allocation7]  }
  0x1c   :  { %858 = vmatprep.mubr.msk.f32.mxu0 %vm1114_vm0, %v1113_v0  ;;  %893 = vmatprep.mubr.msk.f32.mxu1 %vm1114_vm0, %v1113_v0  ;;  %v1152_v6 = vand.u32 4294901760, %v55_v3  ;;  %v52_v9 = vld [vmem:[#allocation5 + $0x50] sm:$0xff]  ;;  %v1154_v10 = vand.u32 4294901760, %v54_v7  ;;  %v1156_v11 = vand.u32 4294901760, %v53_v8  ;;  %v51_v13 = vld [vmem:[#allocation5 + $0x48] sm:$0xff]  ;;  %v50_v14 = vld [vmem:[#allocation5 + $0x40] sm:$0xff] }
  0x1d   :  { %v1158_v12 = vand.u32 4294901760, %v52_v9  ;;  %827 = vmatpush3.msra.mxu0 %v1148_v4  ;;  %v1162_v15 = vsub.f32 %v57_v1, %v1148_v4  ;;  %v1165_v16 = vsub.f32 %v56_v2, %v1150_v5  ;;  %v1167_v17 = vand.u32 4294901760, %v51_v13  ;;  %v49_v19 = vld [vmem:[#allocation5 + $0x38] sm:$0xff]  ;;  %v48_v26 = vld [vmem:[#allocation5 + $0x30] sm:$0xff]  ;;  %v47_v36 = vld [vmem:[#allocation5 + $0x28] sm:$0xff]  ;;  %s713_s25 = sshll.u32 %s1115_s24, 4  ;;  %s714_s25 = int_to_ptr.vmem [resolvable:$true] %s713_s25 }
  0x1e   :  { %v1170_v18 = vsub.f32 %v55_v3, %v1152_v6  ;;  %828 = vmatprep.subr.mxu0 %v1113_v0  ;;  %v1174_v20 = vsub.f32 %v54_v7, %v1154_v10  ;;  %v1177_v21 = vsub.f32 %v53_v8, %v1156_v11  ;;  %v1183_v25 = vand.u32 4294901760, %v50_v14  ;;  %v46_v41 = vld [vmem:[#allocation5 + $0x20] sm:$0xff]  ;;  %v45_v49 = vld [vmem:[#allocation5 + $0x18] sm:$0xff]  ;;  %v44_v54 = vld [vmem:[#allocation5 + $0x10] sm:$0xff]  ;;  %s1083_s26 = scalar_lea.vmem %s714_s25, 128  ;;  %p1088_p11 = scmp.lt.s32.totalorder %s714_s25, %s714_s25 }
  0x1f   :  { %829 = vmatpush3.msra.mxu0 %v1150_v5  ;;  %v159_v22 = vand.u32 4294901760, %v1162_v15  ;;  %v166_v23 = vand.u32 4294901760, %v1165_v16  ;;  %v1187_v28 = vand.u32 4294901760, %v49_v19  ;;  %v1191_v30 = vsub.f32 %v52_v9, %v1158_v12  ;;  %v41_v50 = vld [vmem:[#allocation2] sm:$0xff]  ;;  %v43_v60 = vld [vmem:[#allocation5 + $0x8] sm:$0xff]  ;;  %v42_v7 = vld [vmem:[#allocation5] sm:$0xff]  ;;  %p1084_p10 = scmp.ne.s32.totalorder %s714_s25, %s1083_s26  ;;  %p1089_p12 = scmp.lt.s32.totalorder %s1083_s26, %s1083_s26 }
  0x20   :  { %v173_v24 = vand.u32 4294901760, %v1170_v18  ;;  %830 = vmatprep.subr.mxu0 %v1113_v0  ;;  %v180_v27 = vand.u32 4294901760, %v1174_v20  ;;  %v187_v29 = vand.u32 4294901760, %v1177_v21  ;;  %v1204_v34 = vsub.f32 %v51_v13, %v1167_v17 }
  0x21   :  { %831 = vmatpush3.msra.mxu0 %v1152_v6  ;;  %v160_v31 = vsub.f32 %v1162_v15, %v159_v22  ;;  %v167_v32 = vsub.f32 %v1165_v16, %v166_v23  ;;  %v1207_v35 = vand.u32 4294901760, %v48_v26  ;;  %v194_v40 = vand.u32 4294901760, %v1191_v30  ;;  %p1090_p13 = por %p1089_p12, %p1088_p11 }
  0x22   :  { %v174_v33 = vsub.f32 %v1170_v18, %v173_v24  ;;  %832 = vmatprep.subr.mxu0 %v1113_v0  ;;  %v181_v39 = vsub.f32 %v1174_v20, %v180_v27  ;;  %v188_v42 = vsub.f32 %v1177_v21, %v187_v29  ;;  %v1219_v43 = vsub.f32 %v50_v14, %v1183_v25 }
  0x23   :  { %833 = vmatpush3.msra.mxu0 %v1154_v10  ;;  %v161_v37 = vand.u32 4294901760, %v160_v31  ;;  %v168_v38 = vand.u32 4294901760, %v167_v32  ;;  %v1222_v45 = vand.u32 4294901760, %v47_v36  ;;  %v201_v46 = vand.u32 4294901760, %v1204_v34  ;;  %p1091_p0 = pnand %p1090_p13, %p1084_p10 }
  0x24   :  { %834 = vmatprep.subr.mxu0 %v1113_v0  ;;  %v175_v44 = vand.u32 4294901760, %v174_v33  ;;  %v1226_v47 = vsub.f32 %v49_v19, %v1187_v28  ;;  %v1230_v48 = vand.u32 4294901760, %v46_v41  ;;  %v182_v51 = vand.u32 4294901760, %v181_v39 }
  0x25   :  { %835 = vmatpush3.msra.mxu0 %v1156_v11  ;;  %862 = vmatpush3.msra.mxu1 %v161_v37  ;;  %v195_v52 = vsub.f32 %v1191_v30, %v194_v40  ;;  %v208_v53 = vand.u32 4294901760, %v1219_v43  ;;  %v1238_v55 = vsub.f32 %v48_v26, %v1207_v35  ;;  %v189_v56 = vand.u32 4294901760, %v188_v42 }
  0x26   :  { %836 = vmatprep.subr.mxu0 %v1113_v0  ;;  %863 = vmatprep.subr.mxu1 %v1113_v0  ;;  %v215_v57 = vand.u32 4294901760, %v1226_v47  ;;  %v202_v58 = vsub.f32 %v1204_v34, %v201_v46  ;;  %v1247_v59 = vand.u32 4294901760, %v45_v49  ;;  %v1250_v61 = vsub.f32 %v47_v36, %v1222_v45 }
  0x27   :  { %837 = vmatpush3.msra.mxu0 %v1158_v12  ;;  %864 = vmatpush3.msra.mxu1 %v168_v38  ;;  %v1252_v62 = vand.u32 4294901760, %v41_v50  ;;  %v1256_v63 = vand.u32 4294901760, %v44_v54  ;;  %v196_v1 = vand.u32 4294901760, %v195_v52  ;;  %v209_v2 = vsub.f32 %v1219_v43, %v208_v53 }
  0x28   :  { %838 = vmatprep.subr.mxu0 %v1113_v0  ;;  %865 = vmatprep.subr.mxu1 %v1113_v0  ;;  %v222_v3 = vand.u32 4294901760, %v1238_v55  ;;  %v1264_v8 = vsub.f32 %v46_v41, %v1230_v48  ;;  %v216_v9 = vsub.f32 %v1226_v47, %v215_v57  ;;  %v1271_v13 = vand.u32 4294901760, %v43_v60 }
  0x29   :  { %839 = vmatpush3.msra.mxu0 %v1167_v17  ;;  %866 = vmatpush3.msra.mxu1 %v175_v44  ;;  %v203_v14 = vand.u32 4294901760, %v202_v58  ;;  %v229_v19 = vand.u32 4294901760, %v1250_v61  ;;  %v1276_v26 = vsub.f32 %v41_v50, %v1252_v62  ;;  %v1279_v31 = vsub.f32 %v45_v49, %v1247_v59 }
  0x2a   :  { %840 = vmatprep.subr.mxu0 %v1113_v0  ;;  %867 = vmatprep.subr.mxu1 %v1113_v0  ;;  %v1283_v32 = vand.u32 4294901760, %v42_v7  ;;  %v210_v33 = vand.u32 4294901760, %v209_v2  ;;  %v223_v36 = vsub.f32 %v1238_v55, %v222_v3  ;;  %v236_v37 = vand.u32 4294901760, %v1264_v8 }
  0x2b   :  { %841 = vmatpush3.msra.mxu0 %v1183_v25  ;;  %868 = vmatpush3.msra.mxu1 %v182_v51  ;;  %v1291_v38 = vsub.f32 %v44_v54, %v1256_v63  ;;  %v217_v39 = vand.u32 4294901760, %v216_v9  ;;  %v230_v41 = vsub.f32 %v1250_v61, %v229_v19  ;;  %v148_v42 = vand.u32 4294901760, %v1276_v26 }
  0x2c   :  { %842 = vmatprep.subr.mxu0 %v1113_v0  ;;  %869 = vmatprep.subr.mxu1 %v1113_v0  ;;  %v243_v44 = vand.u32 4294901760, %v1279_v31  ;;  %v1302_v49 = vsub.f32 %v43_v60, %v1271_v13  ;;  %v224_v50 = vand.u32 4294901760, %v223_v36  ;;  %v237_v51 = vsub.f32 %v1264_v8, %v236_v37 }
  0x2d   :  { %843 = vmatpush3.msra.mxu0 %v1187_v28  ;;  %870 = vmatpush3.msra.mxu1 %v189_v56  ;;  %v250_v52 = vand.u32 4294901760, %v1291_v38  ;;  %v1312_v54 = vsub.f32 %v42_v7, %v1283_v32  ;;  %v231_v56 = vand.u32 4294901760, %v230_v41  ;;  %v149_v58 = vsub.f32 %v1276_v26, %v148_v42 }
  0x2e   :  { %844 = vmatprep.subr.mxu0 %v1113_v0  ;;  %871 = vmatprep.subr.mxu1 %v1113_v0  ;;  %v244_v60 = vsub.f32 %v1279_v31, %v243_v44  ;;  %v238_v2 = vand.u32 4294901760, %v237_v51 }
  0x2f   :  { %845 = vmatpush3.msra.mxu0 %v1207_v35  ;;  %872 = vmatpush3.msra.mxu1 %v196_v1  ;;  %v257_v1 = vand.u32 4294901760, %v1302_v49  ;;  %v251_v7 = vsub.f32 %v1291_v38, %v250_v52  ;;  %v264_v9 = vand.u32 4294901760, %v1312_v54 }
  0x30   :  { %846 = vmatprep.subr.mxu0 %v1113_v0  ;;  %873 = vmatprep.subr.mxu1 %v1113_v0 }
  0x31   :  { %847 = vmatpush3.msra.mxu0 %v1222_v45  ;;  %874 = vmatpush3.msra.mxu1 %v203_v14  ;;  %v150_v14 = vand.u32 4294901760, %v149_v58  ;;  %v258_v36 = vsub.f32 %v1302_v49, %v257_v1  ;;  %v265_v41 = vsub.f32 %v1312_v54, %v264_v9 }
  0x32   :  { %848 = vmatprep.subr.mxu0 %v1113_v0  ;;  %875 = vmatprep.subr.mxu1 %v1113_v0 }
  0x33   :  { %849 = vmatpush3.msra.mxu0 %v1230_v48  ;;  %876 = vmatpush3.msra.mxu1 %v210_v33  ;;  %v245_v33 = vand.u32 4294901760, %v244_v60  ;;  %v266_v51 = vand.u32 4294901760, %v265_v41 }
  0x34   :  { %850 = vmatprep.subr.mxu0 %v1113_v0  ;;  %877 = vmatprep.subr.mxu1 %v1113_v0 }
  0x35   :  { %851 = vmatpush3.msra.mxu0 %v1247_v59  ;;  %878 = vmatpush3.msra.mxu1 %v217_v39  ;;  %v252_v39 = vand.u32 4294901760, %v251_v7 }
  0x36   :  { %852 = vmatprep.subr.mxu0 %v1113_v0  ;;  %879 = vmatprep.subr.mxu1 %v1113_v0 }
  0x37   :  { %853 = vmatpush3.msra.mxu0 %v1256_v63  ;;  %880 = vmatpush3.msra.mxu1 %v224_v50  ;;  %v259_v50 = vand.u32 4294901760, %v258_v36 }
  0x38   :  { %854 = vmatprep.subr.mxu0 %v1113_v0  ;;  %881 = vmatprep.subr.mxu1 %v1113_v0 }
  0x39   :  { %855 = vmatpush3.msra.mxu0 %v1271_v13  ;;  %882 = vmatpush3.msra.mxu1 %v231_v56 }
  0x3a   :  { %856 = vmatprep.subr.mxu0 %v1113_v0  ;;  %883 = vmatprep.subr.mxu1 %v1113_v0 }
  0x3b   :  { %857 = vmatpush3.msra.mxu0 %v1283_v32  ;;  %884 = vmatpush3.msra.mxu1 %v238_v2 }
  0x3c   :  { %885 = vmatprep.subr.mxu1 %v1113_v0  ;;  %896 = vmatprep.subr.mxu0 %v1113_v0 }
  0x3d   :  { %859 = vmatmul.mubr.f32.vlgmr.msra.gmra.mxu0 %v150_v14  ;;  %886 = vmatpush3.msra.mxu1 %v245_v33 }
  0x3e   :  { %897 = vmatpush3.msra.mxu0 %v1162_v15  ;;  %887 = vmatprep.subr.mxu1 %v1113_v0 }
  0x3f   :  { %898 = vmatprep.subr.mxu0 %v1113_v0  ;;  %888 = vmatpush3.msra.mxu1 %v252_v39 }
  0x40   :  { %899 = vmatpush3.msra.mxu0 %v1165_v16  ;;  %889 = vmatprep.subr.mxu1 %v1113_v0 }
  0x41   :  { %900 = vmatprep.subr.mxu0 %v1113_v0  ;;  %890 = vmatpush3.msra.mxu1 %v259_v50 }
  0x42   :  { %901 = vmatpush3.msra.mxu0 %v1170_v18  ;;  %891 = vmatprep.subr.mxu1 %v1113_v0 }
  0x43   :  { %902 = vmatprep.subr.mxu0 %v1113_v0  ;;  %892 = vmatpush3.msra.mxu1 %v266_v51 }
  0x44   :  { %903 = vmatpush3.msra.mxu0 %v1174_v20  ;;  %894 = vmatmul.mubr.f32.vlgmr.msra.gmra.mxu1 %v1252_v62 }
  0x45   :  { %904 = vmatprep.subr.mxu0 %v1113_v0  ;;  %931 = vmatprep.subr.mxu1 %v1113_v0 }
  0x46   :  { %905 = vmatpush3.msra.mxu0 %v1177_v21  ;;  %932 = vmatpush3.msra.mxu1 %v1148_v4 }
  0x47   :  { %906 = vmatprep.subr.mxu0 %v1113_v0  ;;  %933 = vmatprep.subr.mxu1 %v1113_v0 }
  0x48   :  { %907 = vmatpush3.msra.mxu0 %v1191_v30  ;;  %934 = vmatpush3.msra.mxu1 %v1150_v5 }
  0x49   :  { %908 = vmatprep.subr.mxu0 %v1113_v0  ;;  %935 = vmatprep.subr.mxu1 %v1113_v0 }
  0x4a   :  { %909 = vmatpush3.msra.mxu0 %v1204_v34  ;;  %936 = vmatpush3.msra.mxu1 %v1152_v6 }
  0x4b   :  { %910 = vmatprep.subr.mxu0 %v1113_v0  ;;  %937 = vmatprep.subr.mxu1 %v1113_v0 }
  0x4c   :  { %911 = vmatpush3.msra.mxu0 %v1219_v43  ;;  %938 = vmatpush3.msra.mxu1 %v1154_v10 }
  0x4d   :  { %912 = vmatprep.subr.mxu0 %v1113_v0  ;;  %939 = vmatprep.subr.mxu1 %v1113_v0 }
  0x4e   :  { %913 = vmatpush3.msra.mxu0 %v1226_v47  ;;  %940 = vmatpush3.msra.mxu1 %v1156_v11 }
  0x4f   :  { %914 = vmatprep.subr.mxu0 %v1113_v0  ;;  %941 = vmatprep.subr.mxu1 %v1113_v0 }
  0x50   :  { %915 = vmatpush3.msra.mxu0 %v1238_v55  ;;  %942 = vmatpush3.msra.mxu1 %v1158_v12 }
  0x51   :  { %916 = vmatprep.subr.mxu0 %v1113_v0  ;;  %943 = vmatprep.subr.mxu1 %v1113_v0 }
  0x52   :  { %917 = vmatpush3.msra.mxu0 %v1250_v61  ;;  %944 = vmatpush3.msra.mxu1 %v1167_v17 }
  0x53   :  { %918 = vmatprep.subr.mxu0 %v1113_v0  ;;  %945 = vmatprep.subr.mxu1 %v1113_v0 }
  0x54   :  { %919 = vmatpush3.msra.mxu0 %v1264_v8  ;;  %946 = vmatpush3.msra.mxu1 %v1183_v25 }
  0x55   :  { %920 = vmatprep.subr.mxu0 %v1113_v0  ;;  %947 = vmatprep.subr.mxu1 %v1113_v0 }
  0x56   :  { %921 = vmatpush3.msra.mxu0 %v1279_v31  ;;  %948 = vmatpush3.msra.mxu1 %v1187_v28 }
  0x57   :  { %922 = vmatprep.subr.mxu0 %v1113_v0  ;;  %949 = vmatprep.subr.mxu1 %v1113_v0 }
  0x58   :  { %923 = vmatpush3.msra.mxu0 %v1291_v38  ;;  %950 = vmatpush3.msra.mxu1 %v1207_v35 }
  0x59   :  { %924 = vmatprep.subr.mxu0 %v1113_v0  ;;  %951 = vmatprep.subr.mxu1 %v1113_v0 }
  0x5a   :  { %925 = vmatpush3.msra.mxu0 %v1302_v49  ;;  %952 = vmatpush3.msra.mxu1 %v1222_v45 }
  0x5b   :  { %926 = vmatprep.subr.mxu0 %v1113_v0  ;;  %953 = vmatprep.subr.mxu1 %v1113_v0 }
  0x5c   :  { %927 = vmatpush3.msra.mxu0 %v1312_v54  ;;  %928 = vmatprep.mubr.msk.f32.mxu0 %vm1114_vm0, %v1113_v0 }
  0x5d   :  { %954 = vmatpush3.msra.mxu1 %v1230_v48  ;;  %929 = vmatmul.mubr.f32.vlgmr.msra.gmra.mxu0 %v1276_v26 }
  0x5e   :  { %955 = vmatprep.subr.mxu1 %v1113_v0  ;;  %966 = vmatprep.subr.mxu0 %v1113_v0 }
  0x5f   :  { %956 = vmatpush3.msra.mxu1 %v1247_v59  ;;  %967 = vmatpush3.msra.mxu0 %v159_v22 }
  0x60   :  { %957 = vmatprep.subr.mxu1 %v1113_v0  ;;  %968 = vmatprep.subr.mxu0 %v1113_v0 }
  0x61   :  { %958 = vmatpush3.msra.mxu1 %v1256_v63  ;;  %969 = vmatpush3.msra.mxu0 %v166_v23 }
  0x62   :  { %959 = vmatprep.subr.mxu1 %v1113_v0  ;;  %970 = vmatprep.subr.mxu0 %v1113_v0 }
  0x63   :  { %960 = vmatpush3.msra.mxu1 %v1271_v13  ;;  %971 = vmatpush3.msra.mxu0 %v173_v24 }
  0x64   :  { %961 = vmatprep.subr.mxu1 %v1113_v0  ;;  %972 = vmatprep.subr.mxu0 %v1113_v0 }
  0x65   :  { %962 = vmatpush3.msra.mxu1 %v1283_v32  ;;  %963 = vmatprep.mubr.msk.f32.mxu1 %vm1114_vm0, %v1113_v0 }
  0x66   :  { %973 = vmatpush3.msra.mxu0 %v180_v27  ;;  %964 = vmatmul.mubr.f32.vlgmr.msra.gmra.mxu1 %v148_v42 }
  0x67   :  { %974 = vmatprep.subr.mxu0 %v1113_v0  ;;  %1001 = vmatprep.subr.mxu1 %v1113_v0 }
  0x68   :  { %975 = vmatpush3.msra.mxu0 %v187_v29  ;;  %1002 = vmatpush3.msra.mxu1 %v1148_v4 }
  0x69   :  { %976 = vmatprep.subr.mxu0 %v1113_v0  ;;  %1003 = vmatprep.subr.mxu1 %v1113_v0 }
  0x6a   :  { %977 = vmatpush3.msra.mxu0 %v194_v40  ;;  %1004 = vmatpush3.msra.mxu1 %v1150_v5 }
  0x6b   :  { %978 = vmatprep.subr.mxu0 %v1113_v0  ;;  %1005 = vmatprep.subr.mxu1 %v1113_v0 }
  0x6c   :  { %979 = vmatpush3.msra.mxu0 %v201_v46  ;;  %1006 = vmatpush3.msra.mxu1 %v1152_v6 }
  0x6d   :  { %980 = vmatprep.subr.mxu0 %v1113_v0  ;;  %1007 = vmatprep.subr.mxu1 %v1113_v0 }
  0x6e   :  { %981 = vmatpush3.msra.mxu0 %v208_v53  ;;  %1008 = vmatpush3.msra.mxu1 %v1154_v10 }
  0x6f   :  { %982 = vmatprep.subr.mxu0 %v1113_v0  ;;  %1009 = vmatprep.subr.mxu1 %v1113_v0 }
  0x70   :  { %983 = vmatpush3.msra.mxu0 %v215_v57  ;;  %1010 = vmatpush3.msra.mxu1 %v1156_v11 }
  0x71   :  { %984 = vmatprep.subr.mxu0 %v1113_v0  ;;  %1011 = vmatprep.subr.mxu1 %v1113_v0 }
  0x72   :  { %985 = vmatpush3.msra.mxu0 %v222_v3  ;;  %1012 = vmatpush3.msra.mxu1 %v1158_v12 }
  0x73   :  { %986 = vmatprep.subr.mxu0 %v1113_v0  ;;  %1013 = vmatprep.subr.mxu1 %v1113_v0 }
  0x74   :  { %987 = vmatpush3.msra.mxu0 %v229_v19  ;;  %1014 = vmatpush3.msra.mxu1 %v1167_v17  ;;  %v723_v17 = vld [vmem:[%s1513_s2] ss:$0 sm:$0xff] }
  0x75   :  { %988 = vmatprep.subr.mxu0 %v1113_v0  ;;  %1015 = vmatprep.subr.mxu1 %v1113_v0 }
  0x76   :  { %989 = vmatpush3.msra.mxu0 %v236_v37  ;;  %1016 = vmatpush3.msra.mxu1 %v1183_v25 }
  0x77   :  { %990 = vmatprep.subr.mxu0 %v1113_v0  ;;  %1017 = vmatprep.subr.mxu1 %v1113_v0 }
  0x78   :  { %991 = vmatpush3.msra.mxu0 %v243_v44  ;;  %1018 = vmatpush3.msra.mxu1 %v1187_v28 }
  0x79   :  { %992 = vmatprep.subr.mxu0 %v1113_v0  ;;  %1019 = vmatprep.subr.mxu1 %v1113_v0 }
  0x7a   :  { %993 = vmatpush3.msra.mxu0 %v250_v52  ;;  %1020 = vmatpush3.msra.mxu1 %v1207_v35 }
  0x7b   :  { %994 = vmatprep.subr.mxu0 %v1113_v0  ;;  %1021 = vmatprep.subr.mxu1 %v1113_v0 }
  0x7c   :  { %995 = vmatpush3.msra.mxu0 %v257_v1  ;;  %1022 = vmatpush3.msra.mxu1 %v1222_v45 }
  0x7d   :  { %996 = vmatprep.subr.mxu0 %v1113_v0  ;;  %1023 = vmatprep.subr.mxu1 %v1113_v0 }
  0x7e   :  { %997 = vmatpush3.msra.mxu0 %v264_v9  ;;  %998 = vmatprep.mubr.msk.f32.mxu0 %vm1114_vm0, %v1113_v0 }
  0x7f   :  { %1024 = vmatpush3.msra.mxu1 %v1230_v48  ;;  %999 = vmatmul.mubr.f32.vlgmr.msra.gmra.mxu0 %v1252_v62 }
  0x80   :  { %1025 = vmatprep.subr.mxu1 %v1113_v0  ;;  %1033 = vmatprep.mubr.msk.f32.mxu1 %vm1114_vm0, %v1113_v0 }
  0x81   :  { %1026 = vmatpush3.msra.mxu1 %v1247_v59 }
  0x82   :  { %1027 = vmatprep.subr.mxu1 %v1113_v0 }
  0x83   :  { %1028 = vmatpush3.msra.mxu1 %v1256_v63 }
  0x84   :  { %1029 = vmatprep.subr.mxu1 %v1113_v0 }
  0x85   :  { %1030 = vmatpush3.msra.mxu1 %v1271_v13 }
  0x86   :  { %1031 = vmatprep.subr.mxu1 %v1113_v0 }
  0x87   :  { %1032 = vmatpush3.msra.mxu1 %v1283_v32 }
  0x88   :  { %1034 = vmatmul.mubr.f32.vlgmr.msra.gmra.mxu1 %v1252_v62 }
  0xfd   :  { %v152_v4 = vpop.f32.mrf.mxu0 }
  0xfe   :  { %v153_v18 = vadd.f32 %v723_v17, %v152_v4 }
  0xff   :  { %v860_v5 = vpop.f32.mrf.mxu0 }
 0x104   :  { %v303_v6 = vpop.f32.mrf.mxu1 }
 0x105   :  { %v304_v21 = vadd.f32 %v303_v6, %v153_v18 }
 0x106   :  { %v895_v10 = vpop.f32.mrf.mxu1 }
 0x11d   :  { %v407_v11 = vpop.f32.mrf.mxu0 }
 0x11e   :  { %v408_v22 = vadd.f32 %v407_v11, %v304_v21 }
 0x11f   :  { %v930_v12 = vpop.f32.mrf.mxu0 }
 0x126   :  { %v496_v15 = vpop.f32.mrf.mxu1 }
 0x127   :  { %v497_v23 = vadd.f32 %v496_v15, %v408_v22 }
 0x128   :  { %v965_v16 = vpop.f32.mrf.mxu1 }
 0x13f   :  { %v615_v20 = vpop.f32.mrf.mxu0 }
 0x140   :  { %v616_v24 = vadd.f32 %v615_v20, %v497_v23 }
 0x141   :  { %v1000_v0 = vpop.f32.mrf.mxu0 }
 0x148   :  { %v702_v25 = vpop.f32.mrf.mxu1 }
 0x149   :  { %v703_v27 = vadd.f32 %v702_v25, %v616_v24 }
 0x14a   :  { %v1035_v28 = vpop.f32.mrf.mxu1 }
 0x14b   :  { %706 = vst [vmem:[#allocation7] sm:$0xff] %v703_v27 }
 0x14c   :  { %1094 = shalt.err (!%p1091_p0)
}
 0x14d   :  { %716 = dma.vmem_to_hbm [thread:$0]  %s714_s25, 128, %s1514_s3, [#allocation4]  }
 0x14e   :  { %1107 = dma.done.wait [#allocation4], 128  }
 0x14f   :  { %1108 = vsyncadd [#allocation4], 4294967168 }
 0x150   :  { %720 = vsyncpa [#allocation3], 1 }
 0x151   :  { %721 = vsyncpa [#allocation6], 1 }
 0x152   :  { %722 = vsyncpa [#allocation4], 1 }

</bundles_post_ra>
